<compile_context>
chip_gen: v7x
topology: tpu7x:2x2x1
jax: 0.10.0
libtpu: 0.0.40
codegen_flags: <defaults>
</compile_context>

<pallas_src>
import functools

import jax
import jax.numpy as jnp
from jax import lax
from jax.experimental import pallas as pl
from jax.experimental.pallas import tpu as pltpu


def _round_up(x, m):
    return (x + m - 1) // m * m


def _pick_tile(dim, candidates=(512, 384, 256, 128)):
    """Largest 128-multiple tile dividing `dim`; else a padded default."""
    for c in candidates:
        if dim % c == 0:
            return c
    return 256 if dim > 128 else 128


# ----------------------------------------------------------------------------
# Pallas kernel: tiled matmul with fused bias add and optional ReLU.
# Output block (f32) is resident across the K grid axis and doubles as the
# accumulator — no scratch buffer.
# ----------------------------------------------------------------------------
def _matmul_bias_act_kernel(x_ref, w_ref, b_ref, o_ref, *, apply_relu):
    k = pl.program_id(2)

    @pl.when(k == 0)
    def _():
        o_ref[...] = jnp.zeros_like(o_ref)

    o_ref[...] += jnp.dot(
        x_ref[...], w_ref[...], preferred_element_type=jnp.float32
    )

    @pl.when(k == pl.num_programs(2) - 1)
    def _():
        out = o_ref[...] + b_ref[...]          # (tm, tn) + (1, tn) broadcast
        if apply_relu:
            out = jnp.maximum(out, 0.0)
        o_ref[...] = out


def matmul_bias_act(x, w_p, b_p, n_out, *, apply_relu, tn, tk):
    """relu?(x @ W + b).

    x:   (M, K) activations (cast to bf16 + padded here).
    w_p: (Kp, Np) bf16, pre-transposed and pre-padded to (tk, tn) multiples.
    b_p: (1, Np) f32.
    Returns (M, n_out) f32.
    """
    M, K = x.shape
    Kp, Np = w_p.shape

    tm = min(_round_up(max(M, 1), 8), 256)
    Mp = _round_up(M, tm)

    xp = x.astype(jnp.bfloat16)
    if (Mp, Kp) != (M, K):
        xp = jnp.pad(xp, ((0, Mp - M), (0, Kp - K)))

    grid = (Mp // tm, Np // tn, Kp // tk)
    cost = pl.CostEstimate(
        flops=2 * Mp * Np * Kp,
        transcendentals=0,
        bytes_accessed=Mp * Kp * 2 + Kp * Np * 2 + Np * 4 + Mp * Np * 4,
    )

    out = pl.pallas_call(
        functools.partial(_matmul_bias_act_kernel, apply_relu=apply_relu),
        out_shape=jax.ShapeDtypeStruct((Mp, Np), jnp.float32),
        grid_spec=pltpu.PrefetchScalarGridSpec(
            num_scalar_prefetch=0,
            grid=grid,
            in_specs=[
                pl.BlockSpec((tm, tk), lambda i, j, k: (i, k)),
                pl.BlockSpec((tk, tn), lambda i, j, k: (k, j)),
                pl.BlockSpec((1, tn), lambda i, j, k: (0, j)),
            ],
            out_specs=pl.BlockSpec((tm, tn), lambda i, j, k: (i, j)),
        ),
        compiler_params=pltpu.CompilerParams(
            dimension_semantics=("parallel", "parallel", "arbitrary")
        ),
        cost_estimate=cost,
    )(xp, w_p, b_p)
    return out[:M, :n_out]


# ----------------------------------------------------------------------------
# Conv / pooling built on top of the Pallas matmul (NHWC everywhere).
# ----------------------------------------------------------------------------
def _im2col_nhwc(x, kh, kw, stride, padding):
    """x: (N, H, W, C) -> patches (N*OH*OW, kh*kw*C), K ordered (kh, kw, C)."""
    n, h, w, c = x.shape
    xp = jnp.pad(x, ((0, 0), (padding, padding), (padding, padding), (0, 0)))
    hp, wp = h + 2 * padding, w + 2 * padding
    oh = (hp - kh) // stride + 1
    ow = (wp - kw) // stride + 1
    cols = []
    for di in range(kh):
        for dj in range(kw):
            cols.append(
                xp[:, di:di + stride * (oh - 1) + 1:stride,
                       dj:dj + stride * (ow - 1) + 1:stride, :]
            )  # (n, oh, ow, c)
    # Stack kernel offsets just before the channel dim: flattened K ordering is
    # (kh, kw, C) and channels stay minor/lane-dense -> no big transpose.
    patches = jnp.stack(cols, axis=3)               # (n, oh, ow, kh*kw, c)
    # TODO(synk): fuse this gather into the Pallas kernel (index_map over
    # (kh, kw) offsets on the K grid axis) to avoid kh*kw HBM duplication.
    return patches.reshape(n * oh * ow, kh * kw * c), oh, ow


def conv2d_relu(x, layer, stride, padding):
    """NHWC Conv2d + ReLU via im2col + Pallas matmul; returns NHWC f32."""
    n = x.shape[0]
    patches, oh, ow = _im2col_nhwc(x, layer["kh"], layer["kw"], stride, padding)
    out = matmul_bias_act(
        patches, layer["w"], layer["b"], layer["n_out"],
        apply_relu=True, tn=layer["tn"], tk=layer["tk"],
    )
    return out.reshape(n, oh, ow, layer["n_out"])   # already NHWC, no transpose


def max_pool2d(x, k=3, s=2):
    # Plain-JAX glue: MaxPool2d(kernel_size=3, stride=2) on NHWC.
    return lax.reduce_window(
        x, -jnp.inf, lax.max, (1, k, k, 1), (1, s, s, 1), "VALID"
    )


def dense(x, layer, apply_relu):
    return matmul_bias_act(
        x, layer["w"], layer["b"], layer["n_out"],
        apply_relu=apply_relu, tn=layer["tn"], tk=layer["tk"],
    )


# ----------------------------------------------------------------------------
# Parameters (deterministic init, PyTorch shape conventions) + one-time
# conversion to matmul-ready padded bf16 matrices.
# ----------------------------------------------------------------------------
def init_params(key, num_classes=1000):
    conv_shapes = {
        "conv1": (64, 3, 11, 11),
        "conv2": (192, 64, 5, 5),
        "conv3": (384, 192, 3, 3),
        "conv4": (256, 384, 3, 3),
        "conv5": (256, 256, 3, 3),
    }
    fc_shapes = {
        "fc1": (4096, 256),
        "fc2": (4096, 4096),
        "fc3": (num_classes, 4096),
    }
    params = {}
    names = list(conv_shapes) + list(fc_shapes)
    keys = jax.random.split(key, len(names))
    for name, k in zip(names, keys):
        if name in conv_shapes:
            shp = conv_shapes[name]
            fan_in = shp[1] * shp[2] * shp[3]
        else:
            shp = fc_shapes[name]
            fan_in = shp[1]
        scale = 1.0 / jnp.sqrt(jnp.float32(fan_in))
        params[name + "_w"] = jax.random.normal(k, shp, dtype=jnp.float32) * scale
        params[name + "_b"] = jnp.zeros((shp[0],), dtype=jnp.float32)
    return params


def _prepare_matmul_weights(w_kn, b, tk, tn):
    K, N = w_kn.shape
    Kp, Np = _round_up(K, tk), _round_up(N, tn)
    wp = jnp.pad(w_kn, ((0, Kp - K), (0, Np - N))).astype(jnp.bfloat16)
    bp = jnp.pad(b.astype(jnp.float32), (0, Np - N)).reshape(1, Np)
    return wp, bp


def prepare_params(params):
    """One-time: transpose to (K, N), pad to tile multiples, cast to bf16.
    Done outside the forward pass so no per-call weight transpose/pad/copy."""
    prepared = {}
    for name in ("conv1", "conv2", "conv3", "conv4", "conv5"):
        w = params[name + "_w"]                      # (Cout, Cin, kh, kw)
        cout, cin, kh, kw = w.shape
        wmat = jnp.transpose(w, (2, 3, 1, 0)).reshape(kh * kw * cin, cout)
        tk, tn = _pick_tile(wmat.shape[0]), _pick_tile(cout)
        wp, bp = _prepare_matmul_weights(wmat, params[name + "_b"], tk, tn)
        prepared[name] = dict(w=wp, b=bp, n_out=cout, tn=tn, tk=tk, kh=kh, kw=kw)
    for name in ("fc1", "fc2", "fc3"):
        w = params[name + "_w"]                      # (out, in)
        wmat = w.T
        tk, tn = _pick_tile(wmat.shape[0]), _pick_tile(w.shape[0])
        wp, bp = _prepare_matmul_weights(wmat, params[name + "_b"], tk, tn)
        prepared[name] = dict(w=wp, b=bp, n_out=w.shape[0], tn=tn, tk=tk)
    return prepared


# ----------------------------------------------------------------------------
# Forward pass (mirrors AlexNet.forward).
# ----------------------------------------------------------------------------
def alexnet_forward(prepared, x_nchw):
    # Single NCHW -> NHWC conversion at the boundary; NHWC end-to-end after.
    x = jnp.transpose(x_nchw, (0, 2, 3, 1))
    # features
    x = conv2d_relu(x, prepared["conv1"], stride=4, padding=2)
    x = max_pool2d(x)
    x = conv2d_relu(x, prepared["conv2"], stride=1, padding=2)
    x = max_pool2d(x)
    x = conv2d_relu(x, prepared["conv3"], stride=1, padding=1)
    x = conv2d_relu(x, prepared["conv4"], stride=1, padding=1)
    x = conv2d_relu(x, prepared["conv5"], stride=1, padding=1)
    # AdaptiveAvgPool2d((1, 1)) + view(N, -1) -> (N, 256)
    x = jnp.mean(x, axis=(1, 2))
    # classifier
    # TODO(synk): nn.Dropout treated as identity (eval-mode semantics).
    x = dense(x, prepared["fc1"], apply_relu=True)
    x = dense(x, prepared["fc2"], apply_relu=True)
    x = dense(x, prepared["fc3"], apply_relu=False)
    return x


if __name__ == "__main__":
    key = jax.random.PRNGKey(0)
    pkey, xkey = jax.random.split(key)

    num_classes = 1000
    params = init_params(pkey, num_classes=num_classes)
    prepared = prepare_params(params)   # one-time weight transpose/pad/bf16

    # Small input that still survives both 3x3/stride-2 max-pools:
    # 35 -> conv1(k11,s4,p2) 8 -> pool 3 -> conv2 3 -> pool 1 -> conv3..5 1
    x = jax.random.normal(xkey, (2, 3, 35, 35), dtype=jnp.float32)

    out = alexnet_forward(prepared, x)
    out = jax.block_until_ready(out)

    assert out.shape == (2, num_classes), out.shape
    assert bool(jnp.all(jnp.isfinite(out)))
    print("KERNEL_OK")
</pallas_src>

<mosaic_0001>
module attributes {stable_mosaic.version = 11 : i64} {
  func.func @_matmul_bias_act_kernel(%arg0: i32, %arg1: i32, %arg2: i32, %arg3: memref<128x256xbf16, #tpu.memory_space<vmem>>, %arg4: memref<256x128xbf16, #tpu.memory_space<vmem>>, %arg5: memref<1x128xf32, #tpu.memory_space<vmem>>, %arg6: memref<128x128xf32, #tpu.memory_space<vmem>>) attributes {dimension_semantics = [#tpu.dimension_semantics<parallel>, #tpu.dimension_semantics<parallel>, #tpu.dimension_semantics<arbitrary>], iteration_bounds = array<i64: 1, 1, 2>, scalar_prefetch = 0 : i64, scratch_operands = 0 : i64, tpu.core_type = #tpu.core_type<tc>, window_params = [{transform_indices = @transform_0, window_bounds = array<i64: 128, 256>}, {transform_indices = @transform_1, window_bounds = array<i64: 256, 128>}, {transform_indices = @transform_2, window_bounds = array<i64: 1, 128>}, {transform_indices = @transform_3, window_bounds = array<i64: 128, 128>}]} {
    %c0_i32 = arith.constant 0 : i32
    %0 = arith.cmpi eq, %arg2, %c0_i32 : i32
    %1 = arith.extui %0 : i1 to i32
    %c0_i32_0 = arith.constant 0 : i32
    %2 = arith.cmpi ne, %1, %c0_i32_0 : i32
    scf.if %2 {
      %cst_9 = arith.constant 0.000000e+00 : f32
      %12 = vector.broadcast %cst_9 : f32 to vector<128x128xf32>
      %c0_10 = arith.constant 0 : index
      %c0_11 = arith.constant 0 : index
      %13 = vector.load %arg6[%c0_10, %c0_11] : memref<128x128xf32, #tpu.memory_space<vmem>>, vector<128x128xf32>
      tpu.vector_store %arg6[%c0_10, %c0_11], %12 {strides = array<i32>} : memref<128x128xf32, #tpu.memory_space<vmem>>, vector<128x128xf32>,
    } else {
    }
    %c0 = arith.constant 0 : index
    %c0_1 = arith.constant 0 : index
    %3 = vector.load %arg6[%c0, %c0_1] : memref<128x128xf32, #tpu.memory_space<vmem>>, vector<128x128xf32>
    %c0_2 = arith.constant 0 : index
    %c0_3 = arith.constant 0 : index
    %4 = vector.load %arg3[%c0_2, %c0_3] : memref<128x256xbf16, #tpu.memory_space<vmem>>, vector<128x256xbf16>
    %c0_4 = arith.constant 0 : index
    %c0_5 = arith.constant 0 : index
    %5 = vector.load %arg4[%c0_4, %c0_5] : memref<256x128xbf16, #tpu.memory_space<vmem>>, vector<256x128xbf16>
    %cst = arith.constant dense<0.000000e+00> : vector<128x128xf32>
    %6 = tpu.matmul %4, %5, %cst {dimension_numbers = #tpu.dot_dimension_numbers<[1], [0], [0], [1], [0, 0, 1, 1], [], []>} : vector<128x256xbf16>, vector<256x128xbf16>, vector<128x128xf32> -> vector<128x128xf32>
    %7 = arith.addf %3, %6 : vector<128x128xf32>
    %c0_6 = arith.constant 0 : index
    %c0_7 = arith.constant 0 : index
    %8 = vector.load %arg6[%c0_6, %c0_7] : memref<128x128xf32, #tpu.memory_space<vmem>>, vector<128x128xf32>
    tpu.vector_store %arg6[%c0_6, %c0_7], %7 {strides = array<i32>} : memref<128x128xf32, #tpu.memory_space<vmem>>, vector<128x128xf32>,
    %c1_i32 = arith.constant 1 : i32
    %9 = arith.cmpi eq, %arg2, %c1_i32 : i32
    %10 = arith.extui %9 : i1 to i32
    %c0_i32_8 = arith.constant 0 : i32
    %11 = arith.cmpi ne, %10, %c0_i32_8 : i32
    scf.if %11 {
      %c0_9 = arith.constant 0 : index
      %c0_10 = arith.constant 0 : index
      %12 = vector.load %arg6[%c0_9, %c0_10] : memref<128x128xf32, #tpu.memory_space<vmem>>, vector<128x128xf32>
      %c0_11 = arith.constant 0 : index
      %c0_12 = arith.constant 0 : index
      %13 = vector.load %arg5[%c0_11, %c0_12] : memref<1x128xf32, #tpu.memory_space<vmem>>, vector<1x128xf32>
      %14 = vector.broadcast %13 : vector<1x128xf32> to vector<128x128xf32>
      %15 = arith.addf %12, %14 : vector<128x128xf32>
      %cst_13 = arith.constant 0.000000e+00 : f32
      %16 = vector.broadcast %cst_13 : f32 to vector<128x128xf32>
      %17 = arith.maximumf %15, %16 : vector<128x128xf32>
      %c0_14 = arith.constant 0 : index
      %c0_15 = arith.constant 0 : index
      %18 = vector.load %arg6[%c0_14, %c0_15] : memref<128x128xf32, #tpu.memory_space<vmem>>, vector<128x128xf32>
      tpu.vector_store %arg6[%c0_14, %c0_15], %17 {strides = array<i32>} : memref<128x128xf32, #tpu.memory_space<vmem>>, vector<128x128xf32>,
    } else {
    }
    return
  }
  func.func @transform_0(%arg0: i32, %arg1: i32, %arg2: i32) -> (i32, i32) {
    %c0_i32 = arith.constant 0 : i32
    return %arg0, %arg2 : i32, i32
  }
  func.func @transform_1(%arg0: i32, %arg1: i32, %arg2: i32) -> (i32, i32) {
    %c0_i32 = arith.constant 0 : i32
    return %arg2, %arg1 : i32, i32
  }
  func.func @transform_2(%arg0: i32, %arg1: i32, %arg2: i32) -> (i32, i32) {
    %c0_i32 = arith.constant 0 : i32
    %c0_i32_0 = arith.constant 0 : i32
    return %c0_i32, %arg1 : i32, i32
  }
  func.func @transform_3(%arg0: i32, %arg1: i32, %arg2: i32) -> (i32, i32) {
    %c0_i32 = arith.constant 0 : i32
    return %arg0, %arg1 : i32, i32
  }
}

</mosaic_0001>

<bundles_post_ra>
// kernel: tpu_custom_call.1
= control target key start
LH: loop header
LB: loop body
LE: loop exit
PB: predicated region body
PF: predicated region fallthrough
CT: control target
= control target key end

     0   :  { %8 = vsyncpa [#allocation3], 0  ;;  %s1522_s0 = inlined_call_operand.hbm [shape: bf16[128,512], index: 0, kind: input, shape index: {}]   ;;  %s1523_s1 = inlined_call_operand.hbm [shape: bf16[512,128], index: 1, kind: input, shape index: {}]   ;;  %s1524_s2 = inlined_call_operand.vmem [shape: f32[1,128], index: 2, kind: input, shape index: {}]   ;;  %s1525_s3 = inlined_call_operand.hbm [shape: f32[128,128], index: 3, kind: output, shape index: {}]  }
   0x1   :  { %10 = vsyncpa [#allocation3 + $0x1], 0 }
   0x2   :  { %11 = vsyncpa [#allocation6], 0 }
   0x3   :  { %13 = vsyncpa [#allocation6 + $0x1], 0 }
   0x4   :  { %14 = vsyncpa [#allocation4], 0  ;;  %s1279_s12 = smov 0   ;;  %s1281_s13 = smov 0  }
   0x5   :  { %s1283_s14 = smov 0   ;;  %s1285_s15 = smov 0  }
   0x6   :  { %s1287_s16 = smov 0   ;;  %s1289_s17 = smov 0  }
   0x7 LB: > { %s853_s18 = sadd.s32 4294967295, %s1246_s17   ;;  %s32_s19 = sadd.s32 1, %s1242_s16  ;;  %s1246_s17 = sphi %s1289_s17, %s20_s17   ;;  %s1242_s16 = sphi %s1287_s16, %s1538_s16   ;;  %s1238_s15 = sphi %s1285_s15, %s1537_s15   ;;  %s1234_s14 = sphi %s1283_s14, %s1536_s14   ;;  %s1230_s13 = sphi %s1281_s13, %s1535_s13   ;;  %s1226_s12 = sphi %s1279_s12, %s1534_s12  }
   0x8   : > { %p33_p0 = scmp.ge.s32.totalorder %s32_s19, 2  ;;  %s48_s20 = sadd.s32 1, %s1234_s14 }
   0x9   : > { %p55_p1 = scmp.ne.s32.totalorder %s1234_s14, %s1230_s13  ;;  %p56_p2 = scmp.eq.s32.totalorder %s1246_s17, 0 }
   0xa   : > { %s1540_s19 = smov (%p33_p0, %s32_s19), 0  ;;  %p61_p4 = scmp.ne.s32.totalorder %s1230_s13, %s1226_s12 }
   0xb   : > { %p1315_p3 = por %p56_p2, %p55_p1  ;;  %s44_s22 = ssub.s32 %s1242_s16, %s1540_s19 }
   0xc   : > { %p62_p5 = scmp.eq.s32.totalorder %s853_s18, 0  ;;  %p46_p6 = scmp.eq.s32.totalorder %s44_s22, 0 }
   0xd   : > { %p1002_p8 = scmp.lt.s32.totalorder %s1246_s17, 2  ;;  %s1333_s25 = sand.u32 1, %s1234_s14  }
   0xe   : > { %p1324_p7 = por %p62_p5, %p61_p4  ;;  %s905_s26 = sshll.u32 %s1242_s16, 7 }
   0xf   : > { %s1330_s24 = scalar_select %p46_p6, %s1234_s14, %s48_s20  }
  0x10   : > { %s1528_s23 = scalar_select %p1324_p7, 1, 0 }
  0x11   : > { %s857_s27 = sshll.u32 %s1333_s25, 7  ;;  %s1340_s30 = scalar_lea.hbm %s1522_s0, %s905_s26 }
  0x12   : > { %s177_s4 = scalar_lea.vmem [#allocation2], %s857_s27  ;;  %p1346_p9 = pnand %p1002_p8, %p1315_p3 }
  0x13   : > { %s187_s5 = sshll.u32 %s177_s4, 4  ;;  %s174_s7 = scalar_lea.sflag [#allocation3], %s1333_s25  ;;  %s1350_s5 = int_to_ptr.vmem [resolvable:$true] %s187_s5 }
  0x14   : > { %s1102_s8 = scalar_lea.hbm %s1340_s30, 2048  ;;  %p1104_p12 = pneg %p1346_p9 }
  0x15   : > { %p1103_p11 = scmp.ne.s32.totalorder %s1340_s30, %s1102_s8  ;;  %s1107_s11 = scalar_lea.hbm %s1522_s0, 4096 }
  0x16   : > { %p1108_p1 = scmp.lt.u32.totalorder %s1340_s30, %s1522_s0  ;;  %p1109_p2 = scmp.lt.u32.totalorder %s1107_s11, %s1102_s8 }
  0x17   : > { %p1105_p13 = pnand %p1104_p12, %p1103_p11  ;;  %p1111_p4 = scmp.lt.u32.totalorder %s1102_s8, %s1340_s30 }
  0x18   : > { %p1110_p3 = por %p1109_p2, %p1108_p1 }
  0x19   : > { %p1106_p0 = pneg %p1105_p13 }
  0x1a   : > { %p1112_p5 = por %p1111_p4, %p1110_p3 }
  0x1c   : > { %p1113_p6 = pnand %p1112_p5, %p1106_p0 }
  0x1e   : > { %1116 = shalt.err (!%p1113_p6)
}
  0x1f   : > { %s1117_s21 = scalar_lea.vmem %s1350_s5, 2048  ;;  %s1248_s22 = smov [#allocation2]  }
  0x20   : > { %p1118_p8 = scmp.ne.s32.totalorder %s1350_s5, %s1117_s21  ;;  %s1122_s26 = sshll.u32 %s1248_s22, 4  ;;  %s1123_s26 = int_to_ptr.vmem [resolvable:$false] %s1122_s26 }
  0x21   : > { %s1124_s28 = scalar_lea.vmem %s1123_s26, 4096  ;;  %p1125_p10 = scmp.lt.s32.totalorder %s1350_s5, %s1123_s26 }
  0x22   : > { %p1120_p11 = pnand %p1118_p8, %p1104_p12  ;;  %p1126_p1 = scmp.lt.s32.totalorder %s1124_s28, %s1117_s21 }
  0x24   : > { %p1121_p13 = pneg %p1120_p11  ;;  %p1127_p2 = por %p1126_p1, %p1125_p10 }
  0x26   : > { %p1128_p3 = pnand %p1127_p2, %p1121_p13 }
  0x28   : > { %1131 = shalt.err (!%p1128_p3)
}
  0x29   : > { %s1249_s29 = smov 256   ;;  %s1250_s4 = smov 128  }
  0x2a   : > { %s1251_s8 = smov 8   ;;  %p217_p0 = scmp.lt.s32.totalorder %s1246_s17, 3 }
  0x2b   : > { %998 = dma.hbm_to_vmem [thread:$0]  (!%p1346_p9), %s1340_s30, 2048, %s1350_s5, %s174_s7, %s1249_s29, %s1250_s4, %s1251_s8  }
  0x2c   : > { %s906_s9 = sshll.u32 %s1242_s16, 11  ;;  %p1530_p10 = scmp.ge.s32.totalorder %s1246_s17, 1 }
  0x2d   : > { %s1392_s20 = scalar_lea.hbm %s1523_s1, %s906_s9  ;;  %s201_s21 = scalar_lea.vmem [#allocation5], %s857_s27 }
  0x2e   : > { %p1385_p4 = pnand %p1530_p10, %p217_p0  ;;  %s209_s22 = sshll.u32 %s201_s21, 4  ;;  %s1396_s22 = int_to_ptr.vmem [resolvable:$true] %s209_s22 }
  0x2f   : > { %s198_s30 = scalar_lea.sflag [#allocation6], %s1333_s25  ;;  %s1132_s5 = scalar_lea.hbm %s1392_s20, 2048 }
  0x30   : > { %p1133_p5 = scmp.ne.s32.totalorder %s1392_s20, %s1132_s5  ;;  %s1137_s28 = scalar_lea.hbm %s1523_s1, 4096 }
  0x31   : > { %p1138_p11 = scmp.lt.u32.totalorder %s1392_s20, %s1523_s1  ;;  %p1139_p13 = scmp.lt.u32.totalorder %s1137_s28, %s1132_s5 }
  0x32   : > { %p1135_p6 = pnand %p1133_p5, %p1104_p12  ;;  %p1141_p2 = scmp.lt.u32.totalorder %s1132_s5, %s1392_s20 }
  0x33   : > { %p1140_p1 = por %p1139_p13, %p1138_p11 }
  0x34   : > { %p1136_p8 = pneg %p1135_p6 }
  0x35   : > { %p1142_p3 = por %p1141_p2, %p1140_p1 }
  0x37   : > { %p1143_p0 = pnand %p1142_p3, %p1136_p8 }
  0x39   : > { %1146 = shalt.err (!%p1143_p0)
}
  0x3a   : > { %s1147_s27 = scalar_lea.vmem %s1396_s22, 2048  ;;  %s1252_s8 = smov [#allocation5]  }
  0x3b   : > { %p1148_p10 = scmp.ne.s32.totalorder %s1396_s22, %s1147_s27  ;;  %s1152_s9 = sshll.u32 %s1252_s8, 4  ;;  %s1153_s9 = int_to_ptr.vmem [resolvable:$false] %s1152_s9 }
  0x3c   : > { %s1154_s11 = scalar_lea.vmem %s1153_s9, 4096  ;;  %p1155_p7 = scmp.lt.s32.totalorder %s1396_s22, %s1153_s9 }
  0x3d   : > { %p1150_p5 = pnand %p1148_p10, %p1104_p12  ;;  %p1156_p11 = scmp.lt.s32.totalorder %s1154_s11, %s1147_s27 }
  0x3f   : > { %p1151_p6 = pneg %p1150_p5  ;;  %p1157_p13 = por %p1156_p11, %p1155_p7 }
  0x41   : > { %p1158_p1 = pnand %p1157_p13, %p1151_p6 }
  0x43   : > { %1161 = shalt.err (!%p1158_p1)
}
  0x44   : > { %s1253_s12 = smov 64   ;;  %s1254_s21 = smov 4  }
  0x45   : > { %1001 = dma.hbm_to_vmem [thread:$0]  (!%p1346_p9), %s1392_s20, 2048, %s1396_s22, %s198_s30, %s1253_s12, %s1253_s12, %s1254_s21  }
  0x46   : > { %221 = sbr.rel (%p1385_p4) target bundleno = 406 (0x196), region = 32  ;;  %s223_s5 = sand.u32 (!%p1385_p4), 1, %s1230_s13  }
  0x47   : > { %s864_s7 = sshll.u32 (!%p1385_p4), %s223_s5, 7  ;;  %s224_s26 = scalar_lea.sflag (!%p1385_p4), [#allocation3], %s223_s5 }
  0x48   : > { %s1427_s28 = scalar_lea.vmem (!%p1385_p4), [#allocation2], %s864_s7  ;;  %p1532_p7 = scmp.ne.s32.totalorder (!%p1385_p4), %s1528_s23, 0 }
  0x4d   : > { %1213 = dma.done.wait (%p1532_p7), %s224_s26, 2048  }
  0x4e   : > { %1215 = vsyncadd (%p1532_p7), %s224_s26, 4294965248  ;;  %s233_s29 = scalar_lea.sflag [#allocation6], %s223_s5  ;;  %s1433_s6 = scalar_lea.vmem [#allocation5], %s864_s7 }
  0x4f   : > { %1217 = dma.done.wait (%p1532_p7), %s233_s29, 2048  }
  0x50   : > { %1219 = vsyncadd (%p1532_p7), %s233_s29, 4294965248  ;;  %p866_p9 = scmp.ne.s32.totalorder %s1238_s15, 0 }
  0x51   : > { %v1255_v0 = vmov (!%p866_p9), 0.0  }
  0x52   : > { %273 = sbr.rel (%p866_p9) target bundleno = 90 (0x5a), region = 44  ;;  %274 = vst [vmem:[#allocation7] sm:$0xff] (!%p866_p9), %v1255_v0  ;;  %275 = vst [vmem:[#allocation7 + $0x8] sm:$0xff] (!%p866_p9), %v1255_v0 }
  0x53   : > { %276 = vst [vmem:[#allocation7 + $0x10] sm:$0xff] (!%p866_p9), %v1255_v0  ;;  %277 = vst [vmem:[#allocation7 + $0x18] sm:$0xff] (!%p866_p9), %v1255_v0 }
  0x54   : > { %278 = vst [vmem:[#allocation7 + $0x20] sm:$0xff] (!%p866_p9), %v1255_v0  ;;  %279 = vst [vmem:[#allocation7 + $0x28] sm:$0xff] (!%p866_p9), %v1255_v0 }
  0x55   : > { %280 = vst [vmem:[#allocation7 + $0x30] sm:$0xff] (!%p866_p9), %v1255_v0  ;;  %281 = vst [vmem:[#allocation7 + $0x38] sm:$0xff] (!%p866_p9), %v1255_v0 }
  0x56   : > { %282 = vst [vmem:[#allocation7 + $0x40] sm:$0xff] (!%p866_p9), %v1255_v0  ;;  %283 = vst [vmem:[#allocation7 + $0x48] sm:$0xff] (!%p866_p9), %v1255_v0 }
  0x57   : > { %284 = vst [vmem:[#allocation7 + $0x50] sm:$0xff] (!%p866_p9), %v1255_v0  ;;  %285 = vst [vmem:[#allocation7 + $0x58] sm:$0xff] (!%p866_p9), %v1255_v0 }
  0x58   : > { %286 = vst [vmem:[#allocation7 + $0x60] sm:$0xff] (!%p866_p9), %v1255_v0  ;;  %287 = vst [vmem:[#allocation7 + $0x68] sm:$0xff] (!%p866_p9), %v1255_v0 }
  0x59   : > { %288 = vst [vmem:[#allocation7 + $0x70] sm:$0xff] %v1255_v0  ;;  %289 = vst [vmem:[#allocation7 + $0x78] sm:$0xff] %v1255_v0 }
  0x5a PF: > { %v1062_v1 = vld [vmem:[%s1433_s6 + $0x40] sm:$0xff]   ;;  %v1064_v3 = vld [vmem:[%s1433_s6 + $0x48] sm:$0xff]   ;;  %v1066_v5 = vld [vmem:[%s1433_s6 + $0x50] sm:$0xff]   ;;  %p899_p12 = scmp.ne.s32.totalorder %s1238_s15, 1 }
  0x5b   : > { %v1063_v2 = vld [vmem:[%s1433_s6] sm:$0xff]   ;;  %907 = vmatprep.subr.bf16.mxu0 %v1062_v1  ;;  %971 = vmatprep.subr.bf16.mxu1 %v1062_v1  ;;  %v1065_v4 = vld [vmem:[%s1433_s6 + $0x8] sm:$0xff]   ;;  %v1067_v6 = vld [vmem:[%s1433_s6 + $0x10] sm:$0xff]  }
  0x5c   : > { %908 = vmatpush3.bf16.msra.mxu0 %v1063_v2  ;;  %979 = vmatpush3.bf16.msra.mxu1 %v1063_v2  ;;  %v1068_v7 = vld [vmem:[%s1433_s6 + $0x58] sm:$0xff]   ;;  %v1070_v9 = vld [vmem:[%s1433_s6 + $0x60] sm:$0xff]   ;;  %v1072_v11 = vld [vmem:[%s1433_s6 + $0x68] sm:$0xff]  }
  0x5d   : > { %909 = vmatprep.subr.bf16.mxu0 %v1064_v3  ;;  %972 = vmatprep.subr.bf16.mxu1 %v1064_v3  ;;  %v1069_v8 = vld [vmem:[%s1433_s6 + $0x18] sm:$0xff]   ;;  %v1071_v10 = vld [vmem:[%s1433_s6 + $0x20] sm:$0xff]   ;;  %v1073_v14 = vld [vmem:[%s1433_s6 + $0x28] sm:$0xff]  }
  0x5e   : > { %v1080_v12 = vld [vmem:[%s1427_s28 + $0x4] ss:$8 sps:$4 sm:$0xff]   ;;  %v1074_v15 = vld [vmem:[%s1433_s6 + $0x70] sm:$0xff]   ;;  %v1076_v17 = vld [vmem:[%s1433_s6 + $0x78] sm:$0xff]  }
  0x5f   : > { %v1083_v13 = vld [vmem:[%s1427_s28 + $0x44] ss:$8 sps:$4 sm:$0xff]   ;;  %562 = vmatprep.mubr.bf16.mxu0 %v1080_v12  ;;  %v1075_v16 = vld [vmem:[%s1433_s6 + $0x30] sm:$0xff]   ;;  %v1077_v18 = vld [vmem:[%s1433_s6 + $0x38] sm:$0xff]  }
  0x60   : > { %910 = vmatpush3.bf16.msra.mxu0 %v1065_v4  ;;  %980 = vmatpush3.bf16.msra.mxu1 %v1065_v4  ;;  %v1078_v19 = vld [vmem:[%s1427_s28] ss:$8 sps:$4 sm:$0xff]   ;;  %v1084_v21 = vld [vmem:[%s1427_s28 + $0x14] ss:$8 sps:$4 sm:$0xff]   ;;  %v1088_v23 = vld [vmem:[%s1427_s28 + $0x10] ss:$8 sps:$4 sm:$0xff]  }
  0x61   : > { %911 = vmatprep.subr.bf16.mxu0 %v1066_v5  ;;  %973 = vmatprep.subr.bf16.mxu1 %v1066_v5  ;;  %v1081_v20 = vld [vmem:[%s1427_s28 + $0x40] ss:$8 sps:$4 sm:$0xff]   ;;  %v1086_v22 = vld [vmem:[%s1427_s28 + $0x54] ss:$8 sps:$4 sm:$0xff]   ;;  %v1089_v24 = vld [vmem:[%s1427_s28 + $0x50] ss:$8 sps:$4 sm:$0xff]  }
  0x62   : > { %594 = vmatprep.mubr.bf16.mxu1 %v1083_v13  ;;  %v1090_v25 = vld [vmem:[%s1427_s28 + $0x24] ss:$8 sps:$4 sm:$0xff]   ;;  %v1094_v27 = vld [vmem:[%s1427_s28 + $0x20] ss:$8 sps:$4 sm:$0xff]   ;;  %v1096_v29 = vld [vmem:[%s1427_s28 + $0x34] ss:$8 sps:$4 sm:$0xff]  }
  0x63   : > { %v1092_v26 = vld [vmem:[%s1427_s28 + $0x64] ss:$8 sps:$4 sm:$0xff]   ;;  %v1095_v28 = vld [vmem:[%s1427_s28 + $0x60] ss:$8 sps:$4 sm:$0xff]   ;;  %v1098_v30 = vld [vmem:[%s1427_s28 + $0x74] ss:$8 sps:$4 sm:$0xff]  }
  0x64   : > { %912 = vmatpush3.bf16.msra.mxu0 %v1067_v6  ;;  %981 = vmatpush3.bf16.msra.mxu1 %v1067_v6  ;;  %v1100_v31 = vld [vmem:[%s1427_s28 + $0x30] ss:$8 sps:$4 sm:$0xff]   ;;  %v290_v35 = vld [vmem:[#allocation7] sm:$0xff]  ;;  %v291_v43 = vld [vmem:[#allocation7 + $0x8] sm:$0xff] }
  0x65   : > { %913 = vmatprep.subr.bf16.mxu0 %v1068_v7  ;;  %974 = vmatprep.subr.bf16.mxu1 %v1068_v7  ;;  %v1101_v32 = vld [vmem:[%s1427_s28 + $0x70] ss:$8 sps:$4 sm:$0xff]   ;;  %v298_v37 = vld [vmem:[#allocation7 + $0x40] sm:$0xff]  ;;  %v299_v45 = vld [vmem:[#allocation7 + $0x48] sm:$0xff] }
  0x66   : > { %v292_v55 = vld [vmem:[#allocation7 + $0x10] sm:$0xff]  ;;  %v293_v63 = vld [vmem:[#allocation7 + $0x18] sm:$0xff]  ;;  %v302_v13 = vld [vmem:[#allocation7 + $0x60] sm:$0xff] }
  0x67   : > { %v300_v57 = vld [vmem:[#allocation7 + $0x50] sm:$0xff]  ;;  %v301_v1 = vld [vmem:[#allocation7 + $0x58] sm:$0xff] }
  0x68   : > { %914 = vmatpush3.bf16.msra.mxu0 %v1069_v8  ;;  %982 = vmatpush3.bf16.msra.mxu1 %v1069_v8 }
  0x69   : > { %915 = vmatprep.subr.bf16.mxu0 %v1070_v9  ;;  %975 = vmatprep.subr.bf16.mxu1 %v1070_v9 }
  0x6c   : > { %916 = vmatpush3.bf16.msra.mxu0 %v1071_v10  ;;  %983 = vmatpush3.bf16.msra.mxu1 %v1071_v10 }
  0x6d   : > { %917 = vmatprep.subr.bf16.mxu0 %v1072_v11  ;;  %976 = vmatprep.subr.bf16.mxu1 %v1072_v11  ;;  %v294_v11 = vld [vmem:[#allocation7 + $0x20] sm:$0xff] }
  0x70   : > { %918 = vmatpush3.bf16.msra.mxu0 %v1073_v14  ;;  %984 = vmatpush3.bf16.msra.mxu1 %v1073_v14 }
  0x71   : > { %919 = vmatprep.subr.bf16.mxu0 %v1074_v15  ;;  %977 = vmatprep.subr.bf16.mxu1 %v1074_v15 }
  0x74   : > { %920 = vmatpush3.bf16.msra.mxu0 %v1075_v16  ;;  %985 = vmatpush3.bf16.msra.mxu1 %v1075_v16 }
  0x75   : > { %921 = vmatprep.subr.bf16.mxu0 %v1076_v17  ;;  %978 = vmatprep.subr.bf16.mxu1 %v1076_v17 }
  0x78   : > { %922 = vmatpush3.bf16.msra.mxu0 %v1077_v18  ;;  %986 = vmatpush3.bf16.msra.mxu1 %v1077_v18 }
  0x7b   : > { %563 = vmatmul.mubr.bf16.vlgmr.msra.gmra.mrb[0].mxu0 %v1078_v19  ;;  %595 = vmatmul.mubr.bf16.vlgmr.msra.gmra.mrb[0].mxu1 %v1081_v20  ;;  %v295_v19 = vld [vmem:[#allocation7 + $0x28] sm:$0xff] }
  0x7c   : > { %570 = vmatprep.mubr.bf16.mxu0 %v1084_v21  ;;  %602 = vmatprep.mubr.bf16.mxu1 %v1086_v22  ;;  %v303_v21 = vld [vmem:[#allocation7 + $0x68] sm:$0xff] }
  0x83   : > { %571 = vmatmul.mubr.bf16.gmra.mrb[4].mxu0 %v1088_v23  ;;  %603 = vmatmul.mubr.bf16.gmra.mrb[4].mxu1 %v1089_v24 }
  0x84   : > { %578 = vmatprep.mubr.bf16.mxu0 %v1090_v25  ;;  %610 = vmatprep.mubr.bf16.mxu1 %v1092_v26 }
  0x8b   : > { %579 = vmatmul.mubr.bf16.gmra.mrb[8].mxu0 %v1094_v27  ;;  %611 = vmatmul.mubr.bf16.gmra.mrb[8].mxu1 %v1095_v28 }
  0x8c   : > { %586 = vmatprep.mubr.bf16.mxu0 %v1096_v29  ;;  %618 = vmatprep.mubr.bf16.mxu1 %v1098_v30 }
  0x93   : > { %587 = vmatmul.mubr.bf16.gmra.mrb[12].mxu0 %v1100_v31  ;;  %619 = vmatmul.mubr.bf16.gmra.mrb[12].mxu1 %v1101_v32  ;;  %v296_v31 = vld [vmem:[#allocation7 + $0x30] sm:$0xff] }
 0x14e   : > { %v923_v33 = vpop.f32.mrb[0].mxu0  ;;  %v947_v34 = vpop.f32.mrb[0].mxu1 }
 0x14f   : > { %v924_v36 = vpop.f32.mrb[1].mxu0  ;;  %v948_v38 = vpop.f32.mrb[1].mxu1 }
 0x150   : > { %v925_v39 = vadd.f32 %v924_v36, %v923_v33  ;;  %v949_v40 = vadd.f32 %v948_v38, %v947_v34  ;;  %v926_v41 = vpop.f32.mrb[2].mxu0  ;;  %v950_v42 = vpop.f32.mrb[2].mxu1  ;;  %v304_v33 = vld [vmem:[#allocation7 + $0x70] sm:$0xff] }
 0x151   : > { %v927_v44 = vpop.f32.mrb[3].mxu0  ;;  %v951_v46 = vpop.f32.mrb[3].mxu1 }
 0x152   : > { %v627_v47 = vadd.f32 %v925_v39, %v290_v35  ;;  %v635_v48 = vadd.f32 %v949_v40, %v298_v37  ;;  %v928_v49 = vadd.f32 %v927_v44, %v926_v41  ;;  %v952_v50 = vadd.f32 %v951_v46, %v950_v42  ;;  %v297_v39 = vld [vmem:[#allocation7 + $0x38] sm:$0xff] }
 0x153   : > { %v305_v41 = vld [vmem:[#allocation7 + $0x78] sm:$0xff] }
 0x154   : > { %643 = vst [vmem:[#allocation7] sm:$0xff] %v627_v47  ;;  %651 = vst [vmem:[#allocation7 + $0x40] sm:$0xff] %v635_v48  ;;  %v628_v51 = vadd.f32 %v928_v49, %v291_v43  ;;  %v636_v52 = vadd.f32 %v952_v50, %v299_v45  ;;  %v900_v50 = vld [vmem:[%s1524_s2] ss:$0 sm:$0xff] (!%p899_p12) }
 0x156   : > { %644 = vst [vmem:[#allocation7 + $0x8] sm:$0xff] %v628_v51  ;;  %652 = vst [vmem:[#allocation7 + $0x48] sm:$0xff] %v636_v52  ;;  %v929_v53 = vpop.f32.mrb[4].mxu0  ;;  %v953_v54 = vpop.f32.mrb[4].mxu1 }
 0x157   : > { %v930_v56 = vpop.f32.mrb[5].mxu0  ;;  %v954_v58 = vpop.f32.mrb[5].mxu1 }
 0x158   : > { %v931_v59 = vadd.f32 %v930_v56, %v929_v53  ;;  %v955_v60 = vadd.f32 %v954_v58, %v953_v54  ;;  %v932_v61 = vpop.f32.mrb[6].mxu0  ;;  %v956_v62 = vpop.f32.mrb[6].mxu1 }
 0x159   : > { %v933_v0 = vpop.f32.mrb[7].mxu0  ;;  %v957_v2 = vpop.f32.mrb[7].mxu1 }
 0x15a   : > { %v629_v3 = vadd.f32 %v931_v59, %v292_v55  ;;  %v637_v4 = vadd.f32 %v955_v60, %v300_v57  ;;  %v934_v5 = vadd.f32 %v933_v0, %v932_v61  ;;  %v958_v6 = vadd.f32 %v957_v2, %v956_v62 }
 0x15b   : > { %v663_v49 = vld [vmem:[#allocation7] sm:$0xff] (!%p899_p12) }
 0x15c   : > { %645 = vst [vmem:[#allocation7 + $0x10] sm:$0xff] %v629_v3  ;;  %653 = vst [vmem:[#allocation7 + $0x50] sm:$0xff] %v637_v4  ;;  %v630_v7 = vadd.f32 %v934_v5, %v293_v63  ;;  %v638_v8 = vadd.f32 %v958_v6, %v301_v1  ;;  %v686_v52 = vadd.f32 (!%p899_p12), %v900_v50, %v663_v49  ;;  %v671_v3 = vld [vmem:[#allocation7 + $0x40] sm:$0xff] (!%p899_p12) }
 0x15d   : > { %v664_v51 = vld [vmem:[#allocation7 + $0x8] sm:$0xff] (!%p899_p12) }
 0x15e   : > { %646 = vst [vmem:[#allocation7 + $0x18] sm:$0xff] %v630_v7  ;;  %654 = vst [vmem:[#allocation7 + $0x58] sm:$0xff] %v638_v8  ;;  %v935_v9 = vpop.f32.mrb[8].mxu0  ;;  %v959_v10 = vpop.f32.mrb[8].mxu1  ;;  %v687_v53 = vadd.f32 (!%p899_p12), %v900_v50, %v664_v51  ;;  %v702_v63 = vmax.f32 (!%p899_p12), %v686_v52, 0.0  ;;  %v672_v4 = vld [vmem:[#allocation7 + $0x48] sm:$0xff] (!%p899_p12) }
 0x15f   : > { %v936_v12 = vpop.f32.mrb[9].mxu0  ;;  %v960_v14 = vpop.f32.mrb[9].mxu1 }
 0x160   : > { %v937_v15 = vadd.f32 %v936_v12, %v935_v9  ;;  %v961_v16 = vadd.f32 %v960_v14, %v959_v10  ;;  %v938_v17 = vpop.f32.mrb[10].mxu0  ;;  %v962_v18 = vpop.f32.mrb[10].mxu1  ;;  %v703_v0 = vmax.f32 (!%p899_p12), %v687_v53, 0.0  ;;  %718 = vst [vmem:[#allocation7] sm:$0xff] (!%p899_p12), %v702_v63 }
 0x161   : > { %v939_v20 = vpop.f32.mrb[11].mxu0  ;;  %v963_v22 = vpop.f32.mrb[11].mxu1 }
 0x162   : > { %v631_v23 = vadd.f32 %v937_v15, %v294_v11  ;;  %v639_v24 = vadd.f32 %v961_v16, %v302_v13  ;;  %v940_v25 = vadd.f32 %v939_v20, %v938_v17  ;;  %v964_v26 = vadd.f32 %v963_v22, %v962_v18  ;;  %719 = vst [vmem:[#allocation7 + $0x8] sm:$0xff] (!%p899_p12), %v703_v0 }
 0x163   : > { %v665_v54 = vld [vmem:[#allocation7 + $0x10] sm:$0xff] (!%p899_p12)  ;;  %v694_v15 = vadd.f32 (!%p899_p12), %v900_v50, %v671_v3  ;;  %v695_v16 = vadd.f32 (!%p899_p12), %v900_v50, %v672_v4 }
 0x164   : > { %647 = vst [vmem:[#allocation7 + $0x20] sm:$0xff] %v631_v23  ;;  %655 = vst [vmem:[#allocation7 + $0x60] sm:$0xff] %v639_v24  ;;  %v632_v27 = vadd.f32 %v940_v25, %v295_v19  ;;  %v640_v28 = vadd.f32 %v964_v26, %v303_v21  ;;  %v688_v57 = vadd.f32 (!%p899_p12), %v900_v50, %v665_v54  ;;  %v673_v5 = vld [vmem:[#allocation7 + $0x50] sm:$0xff] (!%p899_p12) }
 0x165   : > { %v666_v55 = vld [vmem:[#allocation7 + $0x18] sm:$0xff] (!%p899_p12)  ;;  %v696_v20 = vadd.f32 (!%p899_p12), %v900_v50, %v673_v5  ;;  %v710_v23 = vmax.f32 (!%p899_p12), %v694_v15, 0.0  ;;  %v711_v24 = vmax.f32 (!%p899_p12), %v695_v16, 0.0 }
 0x166   : > { %648 = vst [vmem:[#allocation7 + $0x28] sm:$0xff] %v632_v27  ;;  %656 = vst [vmem:[#allocation7 + $0x68] sm:$0xff] %v640_v28  ;;  %v941_v29 = vpop.f32.mrb[12].mxu0  ;;  %v965_v30 = vpop.f32.mrb[12].mxu1  ;;  %v689_v58 = vadd.f32 (!%p899_p12), %v900_v50, %v666_v55  ;;  %v704_v6 = vmax.f32 (!%p899_p12), %v688_v57, 0.0  ;;  %v674_v10 = vld [vmem:[#allocation7 + $0x58] sm:$0xff] (!%p899_p12) }
 0x167   : > { %v942_v32 = vpop.f32.mrb[13].mxu0  ;;  %v966_v34 = vpop.f32.mrb[13].mxu1  ;;  %v697_v21 = vadd.f32 (!%p899_p12), %v900_v50, %v674_v10  ;;  %v712_v27 = vmax.f32 (!%p899_p12), %v696_v20, 0.0  ;;  %726 = vst [vmem:[#allocation7 + $0x40] sm:$0xff] (!%p899_p12), %v710_v23  ;;  %727 = vst [vmem:[#allocation7 + $0x48] sm:$0xff] (!%p899_p12), %v711_v24 }
 0x168   : > { %v943_v35 = vadd.f32 %v942_v32, %v941_v29  ;;  %v967_v36 = vadd.f32 %v966_v34, %v965_v30  ;;  %v944_v37 = vpop.f32.mrb[14].mxu0  ;;  %v968_v38 = vpop.f32.mrb[14].mxu1  ;;  %662 = sbr.rel (%p899_p12) target bundleno = 380 (0x17c), region = 48  ;;  %v705_v7 = vmax.f32 (!%p899_p12), %v689_v58, 0.0  ;;  %720 = vst [vmem:[#allocation7 + $0x10] sm:$0xff] (!%p899_p12), %v704_v6 }
 0x169   : > { %v945_v40 = vpop.f32.mrb[15].mxu0  ;;  %v969_v42 = vpop.f32.mrb[15].mxu1  ;;  %v713_v28 = vmax.f32 (!%p899_p12), %v697_v21, 0.0  ;;  %728 = vst [vmem:[#allocation7 + $0x50] sm:$0xff] (!%p899_p12), %v712_v27 }
 0x16a   : > { %v633_v43 = vadd.f32 %v943_v35, %v296_v31  ;;  %v641_v44 = vadd.f32 %v967_v36, %v304_v33  ;;  %v946_v45 = vadd.f32 %v945_v40, %v944_v37  ;;  %v970_v46 = vadd.f32 %v969_v42, %v968_v38  ;;  %721 = vst [vmem:[#allocation7 + $0x18] sm:$0xff] (!%p899_p12), %v705_v7 }
 0x16b   : > { %v667_v56 = vld [vmem:[#allocation7 + $0x20] sm:$0xff] (!%p899_p12)  ;;  %729 = vst [vmem:[#allocation7 + $0x58] sm:$0xff] (!%p899_p12), %v713_v28 }
 0x16c   : > { %649 = vst [vmem:[#allocation7 + $0x30] sm:$0xff] %v633_v43  ;;  %657 = vst [vmem:[#allocation7 + $0x70] sm:$0xff] %v641_v44  ;;  %v634_v47 = vadd.f32 %v946_v45, %v297_v39  ;;  %v642_v48 = vadd.f32 %v970_v46, %v305_v41  ;;  %v690_v59 = vadd.f32 (!%p899_p12), %v900_v50, %v667_v56  ;;  %v675_v11 = vld [vmem:[#allocation7 + $0x60] sm:$0xff] (!%p899_p12) }
 0x16d   : > { %v668_v60 = vld [vmem:[#allocation7 + $0x28] sm:$0xff] (!%p899_p12)  ;;  %v698_v22 = vadd.f32 (!%p899_p12), %v900_v50, %v675_v11 }
 0x16e   : > { %650 = vst [vmem:[#allocation7 + $0x38] sm:$0xff] %v634_v47  ;;  %658 = vst [vmem:[#allocation7 + $0x78] sm:$0xff] %v642_v48  ;;  %v691_v1 = vadd.f32 (!%p899_p12), %v900_v50, %v668_v60  ;;  %v706_v8 = vmax.f32 (!%p899_p12), %v690_v59, 0.0  ;;  %v676_v12 = vld [vmem:[#allocation7 + $0x68] sm:$0xff] (!%p899_p12) }
 0x16f   : > { %v699_v25 = vadd.f32 %v900_v50, %v676_v12  ;;  %v714_v29 = vmax.f32 %v698_v22, 0.0 }
 0x170   : > { %v707_v13 = vmax.f32 %v691_v1, 0.0  ;;  %722 = vst [vmem:[#allocation7 + $0x20] sm:$0xff] %v706_v8 }
 0x171   : > { %v715_v31 = vmax.f32 %v699_v25, 0.0  ;;  %730 = vst [vmem:[#allocation7 + $0x60] sm:$0xff] %v714_v29 }
 0x172   : > { %723 = vst [vmem:[#allocation7 + $0x28] sm:$0xff] %v707_v13 }
 0x173   : > { %v669_v61 = vld [vmem:[#allocation7 + $0x30] sm:$0xff]  ;;  %731 = vst [vmem:[#allocation7 + $0x68] sm:$0xff] %v715_v31 }
 0x174   : > { %v692_v2 = vadd.f32 %v900_v50, %v669_v61  ;;  %v677_v17 = vld [vmem:[#allocation7 + $0x70] sm:$0xff] }
 0x175   : > { %v670_v62 = vld [vmem:[#allocation7 + $0x38] sm:$0xff]  ;;  %v700_v26 = vadd.f32 %v900_v50, %v677_v17 }
 0x176   : > { %v693_v9 = vadd.f32 %v900_v50, %v670_v62  ;;  %v708_v14 = vmax.f32 %v692_v2, 0.0  ;;  %v678_v18 = vld [vmem:[#allocation7 + $0x78] sm:$0xff] }
 0x177   : > { %v701_v30 = vadd.f32 %v900_v50, %v678_v18  ;;  %v716_v32 = vmax.f32 %v700_v26, 0.0 }
 0x178   : > { %v709_v19 = vmax.f32 %v693_v9, 0.0  ;;  %724 = vst [vmem:[#allocation7 + $0x30] sm:$0xff] %v708_v14 }
 0x179   : > { %v717_v33 = vmax.f32 %v701_v30, 0.0  ;;  %732 = vst [vmem:[#allocation7 + $0x70] sm:$0xff] %v716_v32 }
 0x17a   : > { %725 = vst [vmem:[#allocation7 + $0x38] sm:$0xff] %v709_v19 }
 0x17b   : > { %733 = vst [vmem:[#allocation7 + $0x78] sm:$0xff] %v717_v33 }
 0x17c PF: > { %p1478_p4 = scmp.eq.s32.totalorder %s853_s18, 1  ;;  %s1256_s10 = smov [#allocation7]  }
 0x17d   : > { %s744_s20 = sshll.u32 %s1256_s10, 4  ;;  %s745_s20 = int_to_ptr.vmem [resolvable:$true] %s744_s20 }
 0x17e   : > { %s1162_s22 = scalar_lea.vmem %s745_s20, 2048  ;;  %p1169_p0 = scmp.lt.s32.totalorder %s745_s20, %s745_s20 }
 0x17f   : > { %p1163_p8 = scmp.ne.s32.totalorder %s745_s20, %s1162_s22  ;;  %p1170_p10 = scmp.lt.s32.totalorder %s1162_s22, %s1162_s22 }
 0x181   : > { %p1164_p2 = pnand %p1163_p8, %p1478_p4  ;;  %p1171_p5 = por %p1170_p10, %p1169_p0 }
 0x183   : > { %p1165_p3 = pneg %p1164_p2 }
 0x185   : > { %p1172_p6 = pnand %p1171_p5, %p1165_p3 }
 0x187   : > { %1175 = shalt.err (!%p1172_p6)
}
 0x188   : > { %s1176_s18 = scalar_lea.hbm %s1525_s3, 2048 }
 0x189   : > { %p1177_p11 = scmp.ne.s32.totalorder %s1525_s3, %s1176_s18  ;;  %p1182_p7 = scmp.lt.u32.totalorder %s1176_s18, %s1525_s3 }
 0x18b   : > { %p1178_p13 = pnand %p1177_p11, %p1478_p4 }
 0x18d   : > { %p1179_p1 = pneg %p1178_p13 }
 0x18f   : > { %p1184_p9 = pnand %p1182_p7, %p1179_p1 }
 0x191   : > { %1187 = shalt.err (!%p1184_p9)
}
 0x192   : > { %s1257_s12 = smov 128   ;;  %s1258_s21 = smov 8  }
 0x193   : > { %992 = dma.vmem_to_hbm [thread:$0]  (%p1478_p4), %s745_s20, 2048, %s1525_s3, [#allocation4], %s1257_s12, %s1257_s12, %s1258_s21  }
 0x194   : > { %1221 = dma.done.wait (%p1478_p4), [#allocation4], 2048  }
 0x195   : > { %1223 = vsyncadd (%p1478_p4), [#allocation4], 4294965248 }
 0x196 PF: > { %s20_s17 = sadd.s32 1, %s1246_s17   ;;  %s1534_s12 = smov %s1230_s13 }
 0x197   : > { %p17_p12 = scmp.ge.s32.totalorder %s20_s17, 4   ;;  %s1535_s13 = smov %s1234_s14 }
 0x198   : > { %s1536_s14 = smov %s1330_s24  ;;  %s1537_s15 = smov %s1242_s16 }
 0x199   : > { %s1538_s16 = smov %s1540_s19  ;;  %19 = sbr.rel (!%p17_p12) target bundleno = 7 (0x7), region = 94 }
 0x1a0   :  { %760 = vsyncpa [#allocation3], 1 }
 0x1a1   :  { %762 = vsyncpa [#allocation3 + $0x1], 1 }
 0x1a2   :  { %763 = vsyncpa [#allocation6], 1 }
 0x1a3   :  { %765 = vsyncpa [#allocation6 + $0x1], 1 }
 0x1a4   :  { %766 = vsyncpa [#allocation4], 1 }
 0x1a5   :  { %768 = vsyncpa [#allocation4 + $0x1], 1 }

</bundles_post_ra>
